<compile_context>
chip_gen: v7x
topology: tpu7x:2x2x1
jax: 0.10.0
libtpu: 0.0.40
codegen_flags: <defaults>
</compile_context>

<pallas_src>
import jax
import jax.numpy as jnp
from jax.experimental import pallas as pl
from jax.experimental.pallas import tpu as pltpu


def _round_up(a, b):
    return (a + b - 1) // b * b


def _pick_tk(f_pad, tb):
    """Largest multiple-of-128 divisor of f_pad, capped by a VMEM budget.

    Caps the per-buffer x tile (TB x TK, f32) at ~6 MiB so triple-buffered
    streams stay well under a 32 MiB scoped VMEM limit on all generations.
    """
    cap_elems = (6 * 1024 * 1024) // (tb * 4)
    cap = max(128, min(4096, (cap_elems // 128) * 128))
    m = f_pad // 128
    for d in range(min(m, cap // 128), 0, -1):
        if m % d == 0:
            return 128 * d
    return 128


def _head_kernel(x_ref, w1_ref, b1_ref, w2_ref, b2_ref, o_ref, acc_ref):
    """Fused head: out = relu(x @ W1 + b1) @ W2 + b2, K-tiled with f32 acc."""
    k = pl.program_id(1)

    @pl.when(k == 0)
    def _():
        acc_ref[...] = jnp.zeros_like(acc_ref)

    # Partial product over this K tile. x is f32 in HBM; cast to bf16 in
    # vregs (no extra HBM pass), f32 accumulation on the MXU.
    acc_ref[...] += jnp.dot(x_ref[...].astype(jnp.bfloat16), w1_ref[...],
                            preferred_element_type=jnp.float32)

    @pl.when(k == pl.num_programs(1) - 1)
    def _():
        h = jnp.maximum(acc_ref[...] + b1_ref[...], 0.0)       # (TB, hidden) f32
        o = jnp.dot(h.astype(w2_ref.dtype), w2_ref[...],
                    preferred_element_type=jnp.float32)        # (TB, OP) f32
        o_ref[...] = (o + b2_ref[...]).astype(o_ref.dtype)


def pack_head_params(params, in_features):
    """One-time packing of the head parameters (call once, reuse per forward).

    W1: (f_pad, hidden) bf16 -- K padded to a multiple of 128 with zeros,
        hidden dim left unpadded (no 4x HBM inflation).
    W2: (hidden, OP=128) bf16 -- output lane-padded so the final store is
        lane-dense; padded columns are zero.
    """
    w1, b1, w2, b2 = params
    f = in_features
    hidden = w1.shape[1]
    out_f = w2.shape[1]
    f_pad = _round_up(f, 128)
    OP = _round_up(out_f, 128)

    w1p = jnp.zeros((f_pad, hidden), jnp.bfloat16)
    w1p = w1p.at[:f, :].set(w1.astype(jnp.bfloat16))
    b1p = b1.reshape(1, hidden).astype(jnp.float32)
    w2p = jnp.zeros((hidden, OP), jnp.bfloat16)
    w2p = w2p.at[:, :out_f].set(w2.astype(jnp.bfloat16))
    b2p = jnp.zeros((1, OP), jnp.float32)
    b2p = b2p.at[:, :out_f].set(b2.reshape(1, out_f).astype(jnp.float32))
    return (w1p, b1p, w2p, b2p), (f, hidden, out_f, f_pad, OP)


def discriminator_forward(x, packed, dims, beta=0.0, reverse=True,
                          use_grad_reverse=True):
    """Forward of Discriminator(head=MLP). grad_reverse is identity in fwd."""
    del beta, reverse  # only affect backward; forward is x.view_as(x)
    if use_grad_reverse:
        x = x  # identity (GradReverse.forward)

    w1p, b1p, w2p, b2p = packed
    f, hidden, out_f, f_pad, OP = dims

    n = x.shape[0]
    x_flat = x.reshape(n, -1)
    assert x_flat.shape[1] == f

    # Batch tiling: one tile covering the whole batch when it is small, so W1
    # is streamed from HBM exactly once; otherwise 256-row tiles (8-aligned).
    if n <= 256:
        TB = n                     # block == full array dim (no 8-row pad)
        n_pad = n
    else:
        TB = 256
        n_pad = _round_up(n, TB)

    TK = _pick_tk(f_pad, TB)

    # Single pad of x only when needed (zero K columns are neutral: the
    # matching W1 rows are zero; zero batch rows are sliced off below).
    if (n_pad, f_pad) != x_flat.shape:
        x_flat = jnp.pad(x_flat, ((0, n_pad - n), (0, f_pad - f)))

    grid = (n_pad // TB, f_pad // TK)
    k_tiles = grid[1]

    # Deeper buffering on the streamed operands only pays off with enough
    # K steps to overlap; otherwise use the default double buffering.
    if k_tiles >= 3:
        x_spec = pl.BlockSpec((TB, TK), lambda i, k: (i, k),
                              pipeline_mode=pl.Buffered(3))
        w1_spec = pl.BlockSpec((TK, hidden), lambda i, k: (k, 0),
                               pipeline_mode=pl.Buffered(3))
    else:
        x_spec = pl.BlockSpec((TB, TK), lambda i, k: (i, k))
        w1_spec = pl.BlockSpec((TK, hidden), lambda i, k: (k, 0))

    cost = pl.CostEstimate(
        flops=2 * n_pad * f_pad * hidden + 2 * n_pad * hidden * OP,
        transcendentals=0,
        bytes_accessed=(x_flat.size * x_flat.dtype.itemsize
                        + grid[0] * w1p.size * 2          # W1 streamed per batch tile
                        + w2p.size * 2 + b1p.size * 4 + b2p.size * 4
                        + n_pad * OP * 4),
    )

    out_padded = pl.pallas_call(
        _head_kernel,
        out_shape=jax.ShapeDtypeStruct((n_pad, OP), jnp.float32),
        grid_spec=pltpu.PrefetchScalarGridSpec(
            num_scalar_prefetch=0,
            grid=grid,
            in_specs=[
                x_spec,                                           # x tile (f32)
                w1_spec,                                          # W1 stream (TK, hidden) bf16
                pl.BlockSpec((1, hidden), lambda i, k: (0, 0)),   # b1 (resident)
                pl.BlockSpec((hidden, OP), lambda i, k: (0, 0)),  # W2 (resident)
                pl.BlockSpec((1, OP), lambda i, k: (0, 0)),       # b2 (resident)
            ],
            out_specs=pl.BlockSpec((TB, OP), lambda i, k: (i, 0)),
            scratch_shapes=[pltpu.VMEM((TB, hidden), jnp.float32)],
        ),
        compiler_params=pltpu.CompilerParams(
            dimension_semantics=("parallel", "arbitrary"),
            vmem_limit_bytes=32 * 1024 * 1024,
        ),
        cost_estimate=cost,
    )(x_flat, w1p, b1p, w2p, b2p)

    return out_padded[:n, :out_f]


def init_head_params(key, in_features, hidden, out_features):
    """Deterministic synthetic head parameters (Linear-ReLU-Linear)."""
    k1, k2, k3, k4 = jax.random.split(key, 4)
    w1 = jax.random.normal(k1, (in_features, hidden), jnp.float32) * 0.02
    b1 = jax.random.normal(k2, (1, hidden), jnp.float32) * 0.01
    w2 = jax.random.normal(k3, (hidden, out_features), jnp.float32) * 0.02
    b2 = jax.random.normal(k4, (1, out_features), jnp.float32) * 0.01
    return w1, b1, w2, b2


if __name__ == "__main__":
    key = jax.random.PRNGKey(0)
    k_x, k_p = jax.random.split(key)

    # Small NCHW input consistent with a conv-feature-map fed discriminator.
    N, C, H, W = 2, 4, 16, 16
    hidden, n_domains = 32, 2
    in_features = C * H * W

    x = jax.random.normal(k_x, (N, C, H, W), jnp.float32)
    params = init_head_params(k_p, in_features, hidden, n_domains)

    # Pack parameters once (outside the per-call forward path).
    packed, dims = pack_head_params(params, in_features)

    out = discriminator_forward(x, packed, dims, beta=0.0, reverse=True,
                                use_grad_reverse=True)
    jax.block_until_ready(out)
    assert out.shape == (N, n_domains)

    # Reference with the same bf16 rounding of operands (f32 accumulation).
    w1, b1, w2, b2 = params
    xb = x.reshape(N, -1).astype(jnp.bfloat16).astype(jnp.float32)
    w1b = w1.astype(jnp.bfloat16).astype(jnp.float32)
    w2b = w2.astype(jnp.bfloat16).astype(jnp.float32)
    hi = jnp.maximum(
        jnp.dot(xb, w1b, precision=jax.lax.Precision.HIGHEST)
        + b1.reshape(1, -1), 0.0)
    hb = hi.astype(jnp.bfloat16).astype(jnp.float32)
    ref = jnp.dot(hb, w2b, precision=jax.lax.Precision.HIGHEST) + b2.reshape(1, -1)
    assert jnp.allclose(out, ref, atol=2e-3, rtol=2e-3)

    print("KERNEL_OK")
</pallas_src>

<mosaic_0001>
module attributes {stable_mosaic.version = 11 : i64} {
  func.func @_head_kernel(%arg0: i32, %arg1: i32, %arg2: memref<2x1024xf32, #tpu.memory_space<vmem>>, %arg3: memref<1024x32xbf16, #tpu.memory_space<vmem>>, %arg4: memref<1x32xf32, #tpu.memory_space<vmem>>, %arg5: memref<32x128xbf16, #tpu.memory_space<vmem>>, %arg6: memref<1x128xf32, #tpu.memory_space<vmem>>, %arg7: memref<2x128xf32, #tpu.memory_space<vmem>>, %arg8: memref<2x32xf32, #tpu.memory_space<vmem>>) attributes {dimension_semantics = [#tpu.dimension_semantics<parallel>, #tpu.dimension_semantics<arbitrary>], iteration_bounds = array<i64: 1, 1>, scalar_prefetch = 0 : i64, scratch_operands = 1 : i64, tpu.core_type = #tpu.core_type<tc>, window_params = [{transform_indices = @transform_0, window_bounds = array<i64: 2, 1024>}, {transform_indices = @transform_1, window_bounds = array<i64: 1024, 32>}, {pipeline_mode = #tpu.pipeline_mode<synchronous>, transform_indices = @transform_2, window_bounds = array<i64: 1, 32>}, {pipeline_mode = #tpu.pipeline_mode<synchronous>, transform_indices = @transform_3, window_bounds = array<i64: 32, 128>}, {pipeline_mode = #tpu.pipeline_mode<synchronous>, transform_indices = @transform_4, window_bounds = array<i64: 1, 128>}, {transform_indices = @transform_5, window_bounds = array<i64: 2, 128>}]} {
    %c0_i32 = arith.constant 0 : i32
    %0 = arith.cmpi eq, %arg1, %c0_i32 : i32
    %1 = arith.extui %0 : i1 to i32
    %c0_i32_0 = arith.constant 0 : i32
    %2 = arith.cmpi ne, %1, %c0_i32_0 : i32
    scf.if %2 {
      %cst_10 = arith.constant 0.000000e+00 : f32
      %13 = vector.broadcast %cst_10 : f32 to vector<2x32xf32>
      %c0_11 = arith.constant 0 : index
      %c0_12 = arith.constant 0 : index
      %14 = vector.load %arg8[%c0_11, %c0_12] : memref<2x32xf32, #tpu.memory_space<vmem>>, vector<2x32xf32>
      tpu.vector_store %arg8[%c0_11, %c0_12], %13 {strides = array<i32>} : memref<2x32xf32, #tpu.memory_space<vmem>>, vector<2x32xf32>,
    } else {
    }
    %c0 = arith.constant 0 : index
    %c0_1 = arith.constant 0 : index
    %3 = vector.load %arg8[%c0, %c0_1] : memref<2x32xf32, #tpu.memory_space<vmem>>, vector<2x32xf32>
    %c0_2 = arith.constant 0 : index
    %c0_3 = arith.constant 0 : index
    %4 = vector.load %arg2[%c0_2, %c0_3] : memref<2x1024xf32, #tpu.memory_space<vmem>>, vector<2x1024xf32>
    %5 = arith.truncf %4 : vector<2x1024xf32> to vector<2x1024xbf16>
    %c0_4 = arith.constant 0 : index
    %c0_5 = arith.constant 0 : index
    %6 = vector.load %arg3[%c0_4, %c0_5] : memref<1024x32xbf16, #tpu.memory_space<vmem>>, vector<1024x32xbf16>
    %cst = arith.constant dense<0.000000e+00> : vector<2x32xf32>
    %7 = tpu.matmul %5, %6, %cst {dimension_numbers = #tpu.dot_dimension_numbers<[1], [0], [0], [1], [0, 0, 1, 1], [], []>} : vector<2x1024xbf16>, vector<1024x32xbf16>, vector<2x32xf32> -> vector<2x32xf32>
    %8 = arith.addf %3, %7 : vector<2x32xf32>
    %c0_6 = arith.constant 0 : index
    %c0_7 = arith.constant 0 : index
    %9 = vector.load %arg8[%c0_6, %c0_7] : memref<2x32xf32, #tpu.memory_space<vmem>>, vector<2x32xf32>
    tpu.vector_store %arg8[%c0_6, %c0_7], %8 {strides = array<i32>} : memref<2x32xf32, #tpu.memory_space<vmem>>, vector<2x32xf32>,
    %c0_i32_8 = arith.constant 0 : i32
    %10 = arith.cmpi eq, %arg1, %c0_i32_8 : i32
    %11 = arith.extui %10 : i1 to i32
    %c0_i32_9 = arith.constant 0 : i32
    %12 = arith.cmpi ne, %11, %c0_i32_9 : i32
    scf.if %12 {
      %c0_10 = arith.constant 0 : index
      %c0_11 = arith.constant 0 : index
      %13 = vector.load %arg8[%c0_10, %c0_11] : memref<2x32xf32, #tpu.memory_space<vmem>>, vector<2x32xf32>
      %c0_12 = arith.constant 0 : index
      %c0_13 = arith.constant 0 : index
      %14 = vector.load %arg4[%c0_12, %c0_13] : memref<1x32xf32, #tpu.memory_space<vmem>>, vector<1x32xf32>
      %15 = vector.broadcast %14 : vector<1x32xf32> to vector<2x32xf32>
      %16 = arith.addf %13, %15 : vector<2x32xf32>
      %cst_14 = arith.constant 0.000000e+00 : f32
      %17 = vector.broadcast %cst_14 : f32 to vector<2x32xf32>
      %18 = arith.maximumf %16, %17 : vector<2x32xf32>
      %19 = arith.truncf %18 : vector<2x32xf32> to vector<2x32xbf16>
      %c0_15 = arith.constant 0 : index
      %c0_16 = arith.constant 0 : index
      %20 = vector.load %arg5[%c0_15, %c0_16] : memref<32x128xbf16, #tpu.memory_space<vmem>>, vector<32x128xbf16>
      %cst_17 = arith.constant dense<0.000000e+00> : vector<2x128xf32>
      %21 = tpu.matmul %19, %20, %cst_17 {dimension_numbers = #tpu.dot_dimension_numbers<[1], [0], [0], [1], [0, 0, 1, 1], [], []>} : vector<2x32xbf16>, vector<32x128xbf16>, vector<2x128xf32> -> vector<2x128xf32>
      %c0_18 = arith.constant 0 : index
      %c0_19 = arith.constant 0 : index
      %22 = vector.load %arg6[%c0_18, %c0_19] : memref<1x128xf32, #tpu.memory_space<vmem>>, vector<1x128xf32>
      %23 = vector.broadcast %22 : vector<1x128xf32> to vector<2x128xf32>
      %24 = arith.addf %21, %23 : vector<2x128xf32>
      %c0_20 = arith.constant 0 : index
      %c0_21 = arith.constant 0 : index
      %25 = vector.load %arg7[%c0_20, %c0_21] : memref<2x128xf32, #tpu.memory_space<vmem>>, vector<2x128xf32>
      tpu.vector_store %arg7[%c0_20, %c0_21], %24 {strides = array<i32>} : memref<2x128xf32, #tpu.memory_space<vmem>>, vector<2x128xf32>,
    } else {
    }
    return
  }
  func.func @transform_0(%arg0: i32, %arg1: i32) -> (i32, i32) {
    %c0_i32 = arith.constant 0 : i32
    return %arg0, %arg1 : i32, i32
  }
  func.func @transform_1(%arg0: i32, %arg1: i32) -> (i32, i32) {
    %c0_i32 = arith.constant 0 : i32
    %c0_i32_0 = arith.constant 0 : i32
    return %arg1, %c0_i32 : i32, i32
  }
  func.func @transform_2(%arg0: i32, %arg1: i32) -> (i32, i32) {
    %c0_i32 = arith.constant 0 : i32
    %c0_i32_0 = arith.constant 0 : i32
    %c0_i32_1 = arith.constant 0 : i32
    return %c0_i32, %c0_i32_0 : i32, i32
  }
  func.func @transform_3(%arg0: i32, %arg1: i32) -> (i32, i32) {
    %c0_i32 = arith.constant 0 : i32
    %c0_i32_0 = arith.constant 0 : i32
    %c0_i32_1 = arith.constant 0 : i32
    return %c0_i32, %c0_i32_0 : i32, i32
  }
  func.func @transform_4(%arg0: i32, %arg1: i32) -> (i32, i32) {
    %c0_i32 = arith.constant 0 : i32
    %c0_i32_0 = arith.constant 0 : i32
    %c0_i32_1 = arith.constant 0 : i32
    return %c0_i32, %c0_i32_0 : i32, i32
  }
  func.func @transform_5(%arg0: i32, %arg1: i32) -> (i32, i32) {
    %c0_i32 = arith.constant 0 : i32
    %c0_i32_0 = arith.constant 0 : i32
    return %arg0, %c0_i32 : i32, i32
  }
}

</mosaic_0001>

<bundles_post_ra>
// kernel: tpu_custom_call.1
= control target key start
LH: loop header
LB: loop body
LE: loop exit
PB: predicated region body
PF: predicated region fallthrough
CT: control target
= control target key end

     0   :  { %v37_v28 = vlaneseq  ;;  %v1118_v36 = vmov 1983009808   ;;  %s1382_s0 = inlined_call_operand.vmem [shape: f32[2,1024], index: 0, kind: input, shape index: {}]   ;;  %s1383_s1 = inlined_call_operand.vmem [shape: bf16[1024,32], index: 1, kind: input, shape index: {}]   ;;  %s1384_s2 = inlined_call_operand.vmem [shape: f32[1,32], index: 2, kind: input, shape index: {}]   ;;  %s1385_s3 = inlined_call_operand.vmem [shape: bf16[32,128], index: 3, kind: input, shape index: {}]   ;;  %s1386_s4 = inlined_call_operand.vmem [shape: f32[1,128], index: 4, kind: input, shape index: {}]   ;;  %s1387_s5 = inlined_call_operand.hbm [shape: f32[2,128], index: 5, kind: output, shape index: {}]  }
   0x1   :  { %v1026_v0 = vld [vmem:[%s1383_s1 + $0x40] sm:$0xff]   ;;  %v1030_v4 = vld [vmem:[%s1383_s1 + $0x48] sm:$0xff]   ;;  %v1034_v8 = vld [vmem:[%s1383_s1 + $0x50] sm:$0xff]   ;;  %v35_v37 = vunpack.c.l.s4 %v1118_v36 }
   0x2   :  { %v1027_v1 = vld [vmem:[%s1383_s1 + $0xc0] sm:$0xff]   ;;  %923 = vmatprep.subr.bf16.mxu0 %v1026_v0  ;;  %v1031_v5 = vld [vmem:[%s1383_s1 + $0xc8] sm:$0xff]   ;;  %v1035_v9 = vld [vmem:[%s1383_s1 + $0xd0] sm:$0xff]   ;;  %v38_v33 = vshrl.u32 %v37_v28, 7 }
   0x3   :  { %v1028_v2 = vld [vmem:[%s1383_s1] sm:$0xff]   ;;  %945 = vmatprep.subr.bf16.mxu1 %v1027_v1  ;;  %v1032_v6 = vld [vmem:[%s1383_s1 + $0x8] sm:$0xff]   ;;  %v1036_v10 = vld [vmem:[%s1383_s1 + $0x10] sm:$0xff]   ;;  %v36_v39 = vunpack.c.0.s8 %v35_v37 }
   0x4   :  { %v1029_v3 = vld [vmem:[%s1383_s1 + $0x80] sm:$0xff]   ;;  %924 = vmatpush3.bf16.msra.mxu0 %v1028_v2  ;;  %v1033_v7 = vld [vmem:[%s1383_s1 + $0x88] sm:$0xff]   ;;  %v1037_v11 = vld [vmem:[%s1383_s1 + $0x90] sm:$0xff]  }
   0x5   :  { %946 = vmatpush3.bf16.msra.mxu1 %v1029_v3  ;;  %925 = vmatprep.subr.bf16.mxu0 %v1030_v4  ;;  %v1038_v12 = vld [vmem:[%s1383_s1 + $0x58] sm:$0xff]   ;;  %v1042_v16 = vld [vmem:[%s1383_s1 + $0x60] sm:$0xff]   ;;  %v1046_v20 = vld [vmem:[%s1383_s1 + $0x68] sm:$0xff]   ;;  %v1257_v41 = vsub.s32 %v36_v39, %v38_v33 }
   0x6   :  { %947 = vmatprep.subr.bf16.mxu1 %v1031_v5  ;;  %v1039_v13 = vld [vmem:[%s1383_s1 + $0xd8] sm:$0xff]   ;;  %v1043_v17 = vld [vmem:[%s1383_s1 + $0xe0] sm:$0xff]   ;;  %v1047_v21 = vld [vmem:[%s1383_s1 + $0xe8] sm:$0xff]  }
   0x7   :  { %v1040_v14 = vld [vmem:[%s1383_s1 + $0x18] sm:$0xff]   ;;  %v1044_v18 = vld [vmem:[%s1383_s1 + $0x20] sm:$0xff]   ;;  %v1048_v22 = vld [vmem:[%s1383_s1 + $0x28] sm:$0xff]  }
   0x8   :  { %926 = vmatpush3.bf16.msra.mxu0 %v1032_v6  ;;  %v1041_v15 = vld [vmem:[%s1383_s1 + $0x98] sm:$0xff]   ;;  %v1045_v19 = vld [vmem:[%s1383_s1 + $0xa0] sm:$0xff]   ;;  %v1049_v23 = vld [vmem:[%s1383_s1 + $0xa8] sm:$0xff]  }
   0x9   :  { %948 = vmatpush3.bf16.msra.mxu1 %v1033_v7  ;;  %927 = vmatprep.subr.bf16.mxu0 %v1034_v8  ;;  %v1050_v24 = vld [vmem:[%s1383_s1 + $0x70] sm:$0xff]   ;;  %v1054_v29 = vld [vmem:[%s1383_s1 + $0x78] sm:$0xff]   ;;  %v29_v34 = vld [vmem:[%s1382_s0] sm:$0xff] }
   0xa   :  { %949 = vmatprep.subr.bf16.mxu1 %v1035_v9  ;;  %v1051_v25 = vld [vmem:[%s1383_s1 + $0xf0] sm:$0xff]   ;;  %v1055_v30 = vld [vmem:[%s1383_s1 + $0xf8] sm:$0xff]   ;;  %v1059_v35 = vld [vmem:[%s1383_s1 + $0x140] sm:$0xff]   ;;  %v33_v40 = vcombine.high %v29_v34, %v29_v34  ;;  %v40_v42 = vrot.slane %v29_v34, %v1257_v41 }
   0xb   :  { %v1052_v26 = vld [vmem:[%s1383_s1 + $0x30] sm:$0xff]   ;;  %v1056_v31 = vld [vmem:[%s1383_s1 + $0x38] sm:$0xff]   ;;  %v1060_v38 = vld [vmem:[%s1383_s1 + $0x1c0] sm:$0xff]  }
   0xc   :  { %928 = vmatpush3.bf16.msra.mxu0 %v1036_v10  ;;  %v1053_v27 = vld [vmem:[%s1383_s1 + $0xb0] sm:$0xff]   ;;  %v1057_v32 = vld [vmem:[%s1383_s1 + $0xb8] sm:$0xff]   ;;  %v47_v43 = vrot.slane %v33_v40, %v1257_v41  ;;  %v48_v44 = vcombine.high %v40_v42, %v40_v42  ;;  %v1061_v46 = vld [vmem:[%s1383_s1 + $0x100] sm:$0xff]   ;;  %v75_v47 = vpack.c.bf16 %v40_v42, %v40_v42 }
   0xd   :  { %950 = vmatpush3.bf16.msra.mxu1 %v1037_v11  ;;  %929 = vmatprep.subr.bf16.mxu0 %v1038_v12  ;;  %v1062_v49 = vld [vmem:[%s1383_s1 + $0x180] sm:$0xff]   ;;  %v1063_v52 = vld [vmem:[%s1383_s1 + $0x148] sm:$0xff]   ;;  %v1067_v56 = vld [vmem:[%s1383_s1 + $0x150] sm:$0xff]  }
   0xe   :  { %951 = vmatprep.subr.bf16.mxu1 %v1039_v13  ;;  %v49_v45 = vcombine.high %v47_v43, %v47_v43  ;;  %v77_v48 = vpack.c.bf16 %v47_v43, %v47_v43  ;;  %v76_v50 = vpack.c.bf16 %v48_v44, %v48_v44  ;;  %v1064_v53 = vld [vmem:[%s1383_s1 + $0x1c8] sm:$0xff]   ;;  %v1068_v57 = vld [vmem:[%s1383_s1 + $0x1d0] sm:$0xff]   ;;  %v1071_v60 = vld [vmem:[%s1383_s1 + $0x158] sm:$0xff]  }
   0xf   :  { %v1065_v54 = vld [vmem:[%s1383_s1 + $0x108] sm:$0xff]   ;;  %v1069_v58 = vld [vmem:[%s1383_s1 + $0x110] sm:$0xff]   ;;  %v1072_v61 = vld [vmem:[%s1383_s1 + $0x1d8] sm:$0xff]  }
  0x10   :  { %930 = vmatpush3.bf16.msra.mxu0 %v1040_v14  ;;  %v78_v51 = vpack.c.bf16 %v49_v45, %v49_v45  ;;  %627 = vmatprep.mubr.bf16.mxu0 %v76_v50  ;;  %v1066_v55 = vld [vmem:[%s1383_s1 + $0x188] sm:$0xff]   ;;  %v1070_v59 = vld [vmem:[%s1383_s1 + $0x190] sm:$0xff]   ;;  %v1073_v62 = vld [vmem:[%s1383_s1 + $0x118] sm:$0xff]  }
  0x11   :  { %952 = vmatpush3.bf16.msra.mxu1 %v1041_v15  ;;  %931 = vmatprep.subr.bf16.mxu0 %v1042_v16  ;;  %v1074_v63 = vld [vmem:[%s1383_s1 + $0x198] sm:$0xff]   ;;  %v1075_v0 = vld [vmem:[%s1383_s1 + $0x160] sm:$0xff]   ;;  %v1079_v4 = vld [vmem:[%s1383_s1 + $0x168] sm:$0xff]  }
  0x12   :  { %953 = vmatprep.subr.bf16.mxu1 %v1043_v17  ;;  %667 = vmatprep.mubr.bf16.mxu1 %v78_v51  ;;  %v1076_v1 = vld [vmem:[%s1383_s1 + $0x1e0] sm:$0xff]   ;;  %v1080_v5 = vld [vmem:[%s1383_s1 + $0x1e8] sm:$0xff]   ;;  %v1083_v8 = vld [vmem:[%s1383_s1 + $0x170] sm:$0xff]  }
  0x13   :  { %v1077_v2 = vld [vmem:[%s1383_s1 + $0x120] sm:$0xff]   ;;  %v1081_v6 = vld [vmem:[%s1383_s1 + $0x128] sm:$0xff]   ;;  %v1084_v9 = vld [vmem:[%s1383_s1 + $0x1f0] sm:$0xff]  }
  0x14   :  { %932 = vmatpush3.bf16.msra.mxu0 %v1044_v18  ;;  %v1078_v3 = vld [vmem:[%s1383_s1 + $0x1a0] sm:$0xff]   ;;  %v1082_v7 = vld [vmem:[%s1383_s1 + $0x1a8] sm:$0xff]  }
  0x15   :  { %954 = vmatpush3.bf16.msra.mxu1 %v1045_v19  ;;  %933 = vmatprep.subr.bf16.mxu0 %v1046_v20  ;;  %v30_v10 = vld [vmem:[%s1382_s0 + $0x8] sm:$0xff] }
  0x16   :  { %955 = vmatprep.subr.bf16.mxu1 %v1047_v21  ;;  %v57_v11 = vrot.slane %v30_v10, %v1257_v41  ;;  %v50_v12 = vcombine.high %v30_v10, %v30_v10 }
  0x18   :  { %934 = vmatpush3.bf16.msra.mxu0 %v1048_v22 }
  0x19   :  { %956 = vmatpush3.bf16.msra.mxu1 %v1049_v23  ;;  %935 = vmatprep.subr.bf16.mxu0 %v1050_v24 }
  0x1a   :  { %957 = vmatprep.subr.bf16.mxu1 %v1051_v25 }
  0x1c   :  { %936 = vmatpush3.bf16.msra.mxu0 %v1052_v26 }
  0x1d   :  { %958 = vmatpush3.bf16.msra.mxu1 %v1053_v27  ;;  %937 = vmatprep.subr.bf16.mxu0 %v1054_v29 }
  0x1e   :  { %959 = vmatprep.subr.bf16.mxu1 %v1055_v30 }
  0x20   :  { %938 = vmatpush3.bf16.msra.mxu0 %v1056_v31 }
  0x21   :  { %960 = vmatpush3.bf16.msra.mxu1 %v1057_v32  ;;  %967 = vmatprep.subr.bf16.mxu0 %v1059_v35 }
  0x22   :  { %989 = vmatprep.subr.bf16.mxu1 %v1060_v38 }
  0x23   :  { %628 = vmatmul.mubr.bf16.vlgmr.msra.gmra.mrb[0].mxu0 %v75_v47 }
  0x24   :  { %668 = vmatmul.mubr.bf16.vlgmr.msra.gmra.mrb[0].mxu1 %v77_v48  ;;  %968 = vmatpush3.bf16.msra.mxu0 %v1061_v46 }
  0x25   :  { %990 = vmatpush3.bf16.msra.mxu1 %v1062_v49  ;;  %969 = vmatprep.subr.bf16.mxu0 %v1063_v52 }
  0x26   :  { %991 = vmatprep.subr.bf16.mxu1 %v1064_v53 }
  0x28   :  { %970 = vmatpush3.bf16.msra.mxu0 %v1065_v54 }
  0x29   :  { %992 = vmatpush3.bf16.msra.mxu1 %v1066_v55  ;;  %971 = vmatprep.subr.bf16.mxu0 %v1067_v56 }
  0x2a   :  { %993 = vmatprep.subr.bf16.mxu1 %v1068_v57 }
  0x2c   :  { %972 = vmatpush3.bf16.msra.mxu0 %v1069_v58 }
  0x2d   :  { %994 = vmatpush3.bf16.msra.mxu1 %v1070_v59  ;;  %973 = vmatprep.subr.bf16.mxu0 %v1071_v60 }
  0x2e   :  { %995 = vmatprep.subr.bf16.mxu1 %v1072_v61 }
  0x30   :  { %974 = vmatpush3.bf16.msra.mxu0 %v1073_v62 }
  0x31   :  { %996 = vmatpush3.bf16.msra.mxu1 %v1074_v63  ;;  %975 = vmatprep.subr.bf16.mxu0 %v1075_v0 }
  0x32   :  { %997 = vmatprep.subr.bf16.mxu1 %v1076_v1 }
  0x34   :  { %976 = vmatpush3.bf16.msra.mxu0 %v1077_v2 }
  0x35   :  { %998 = vmatpush3.bf16.msra.mxu1 %v1078_v3  ;;  %977 = vmatprep.subr.bf16.mxu0 %v1079_v4 }
  0x36   :  { %999 = vmatprep.subr.bf16.mxu1 %v1080_v5 }
  0x37   :  { %10 = vsyncpa [#allocation4], 0  ;;  %v1085_v13 = vld [vmem:[%s1383_s1 + $0x130] sm:$0xff]   ;;  %v65_v15 = vcombine.high %v57_v11, %v57_v11  ;;  %v64_v16 = vrot.slane %v50_v12, %v1257_v41  ;;  %v1087_v17 = vld [vmem:[%s1383_s1 + $0x178] sm:$0xff]   ;;  %v79_v24 = vpack.c.bf16 %v57_v11, %v57_v11  ;;  %vm26_vm0 = vcmask 254976   ;;  %s1121_s30 = smov [#allocation3]  }
  0x38   :  { %978 = vmatpush3.bf16.msra.mxu0 %v1081_v6  ;;  %v1086_v14 = vld [vmem:[%s1383_s1 + $0x1b0] sm:$0xff]   ;;  %v1088_v18 = vld [vmem:[%s1383_s1 + $0x1f8] sm:$0xff]   ;;  %v1119_v26 = vmov 0.0   ;;  %v1092_v27 = vld [vmem:[%s1385_s3] sm:$0xff]   ;;  %vm1120_vm1 = vmmov 0   ;;  %vm795_vm2 = vcmask 261120  }
  0x39   :  { %1000 = vmatpush3.bf16.msra.mxu1 %v1082_v7  ;;  %979 = vmatprep.subr.bf16.mxu0 %v1083_v8  ;;  %v80_v19 = vpack.c.bf16 %v65_v15, %v65_v15  ;;  %v66_v20 = vcombine.high %v64_v16, %v64_v16  ;;  %v1089_v21 = vld [vmem:[%s1383_s1 + $0x138] sm:$0xff]   ;;  %v81_v25 = vpack.c.bf16 %v64_v16, %v64_v16  ;;  %v1093_v28 = vld [vmem:[%s1385_s3 + $0x8] sm:$0xff]   ;;  %v918_v54 = vld [vmem:[%s1384_s2] ss:$0 sm:$0xff]  ;;  %s846_s6 = sshll.u32 %s1121_s30, 4  ;;  %s847_s6 = int_to_ptr.vmem [resolvable:$true] %s846_s6 }
  0x3a   :  { %1001 = vmatprep.subr.bf16.mxu1 %v1084_v9  ;;  %v1090_v22 = vld [vmem:[%s1383_s1 + $0x1b8] sm:$0xff]   ;;  %27 = vst.msk [vmem:[#allocation2] sm:$0x3] %vm26_vm0, %v1119_v26  ;;  %v919_v59 = vld [vmem:[%s1386_s4] ss:$0 sm:$0xff]  ;;  %s1094_s2 = scalar_lea.vmem %s847_s6, 32  ;;  %p1099_p1 = scmp.lt.s32.totalorder %s847_s6, %s847_s6 }
  0x3b   :  { %v82_v23 = vpack.c.bf16 %v66_v20, %v66_v20  ;;  %707 = vmatprep.mubr.bf16.mxu0 %v80_v19  ;;  %p1095_p0 = scmp.ne.s32.totalorder %s847_s6, %s1094_s2  ;;  %p1100_p2 = scmp.lt.s32.totalorder %s1094_s2, %s1094_s2 }
  0x3c   :  { %980 = vmatpush3.bf16.msra.mxu0 %v1085_v13 }
  0x3d   :  { %1002 = vmatpush3.bf16.msra.mxu1 %v1086_v14  ;;  %981 = vmatprep.subr.bf16.mxu0 %v1087_v17  ;;  %p1101_p3 = por %p1100_p2, %p1099_p1 }
  0x3e   :  { %1003 = vmatprep.subr.bf16.mxu1 %v1088_v18  ;;  %747 = vmatprep.mubr.bf16.mxu1 %v82_v23 }
  0x3f   :  { %p1102_p4 = pnand %p1101_p3, %p1095_p0 }
  0x40   :  { %982 = vmatpush3.bf16.msra.mxu0 %v1089_v21 }
  0x41   :  { %1004 = vmatpush3.bf16.msra.mxu1 %v1090_v22  ;;  %1014 = vmatprep.subr.bf16.mxu0 %v1119_v26  ;;  %v28_v51 = vld [vmem:[#allocation2] sm:$0x3] }
  0x43   :  { %708 = vmatmul.mubr.bf16.vlgmr.msra.gmra.mrb[4].mxu0 %v79_v24 }
  0x44   :  { %748 = vmatmul.mubr.bf16.vlgmr.msra.gmra.mrb[4].mxu1 %v81_v25  ;;  %1018 = vmatprep.mubr.msk.bf16.mxu0 %vm1120_vm1, %v1119_v26 }
  0x45   :  { %1015 = vmatpush3.bf16.msra.mxu0 %v1092_v27 }
  0x46   :  { %1016 = vmatprep.subr.bf16.mxu0 %v1119_v26 }
  0x49   :  { %1017 = vmatpush3.bf16.msra.mxu0 %v1093_v28 }
  0xf6   :  { %v939_v29 = vpop.f32.mrb[0].mxu0 }
  0xf7   :  { %v961_v30 = vpop.f32.mrb[0].mxu1  ;;  %v940_v31 = vpop.f32.mrb[1].mxu0 }
  0xf8   :  { %v962_v32 = vpop.f32.mrb[1].mxu1  ;;  %v941_v33 = vadd.f32 %v940_v31, %v939_v29  ;;  %v942_v35 = vpop.f32.mrb[2].mxu0 }
  0xf9   :  { %v963_v34 = vadd.f32 %v962_v32, %v961_v30  ;;  %v964_v36 = vpop.f32.mrb[2].mxu1  ;;  %v943_v37 = vpop.f32.mrb[3].mxu0 }
  0xfa   :  { %v965_v38 = vpop.f32.mrb[3].mxu1 }
  0xfb   :  { %v670_v39 = vadd.f32 %v963_v34, %v941_v33 }
 0x116   :  { %v983_v40 = vpop.f32.mrb[4].mxu0 }
 0x117   :  { %v1005_v41 = vpop.f32.mrb[4].mxu1  ;;  %v984_v42 = vpop.f32.mrb[5].mxu0 }
 0x118   :  { %v1006_v43 = vpop.f32.mrb[5].mxu1  ;;  %v985_v44 = vadd.f32 %v984_v42, %v983_v40  ;;  %v986_v46 = vpop.f32.mrb[6].mxu0 }
 0x119   :  { %v1007_v45 = vadd.f32 %v1006_v43, %v1005_v41  ;;  %v1008_v47 = vpop.f32.mrb[6].mxu1  ;;  %v987_v48 = vpop.f32.mrb[7].mxu0 }
 0x11a   :  { %v1009_v49 = vpop.f32.mrb[7].mxu1  ;;  %v710_v50 = vadd.f32 %v985_v44, %v670_v39 }
 0x11c   :  { %v750_v52 = vadd.f32 %v1007_v45, %v710_v50 }
 0x11e   :  { %v755_v53 = vadd.f32 %v750_v52, %v28_v51 }
 0x120   :  { %757 = vst.msk [vmem:[#allocation2] sm:$0x3] %vm26_vm0, %v755_v53 }
 0x127   :  { %v761_v55 = vld [vmem:[#allocation2] sm:$0x3] }
 0x128   :  { %v769_v56 = vadd.f32 %v918_v54, %v761_v55 }
 0x12a   :  { %v770_v57 = vmax.f32 %v769_v56, 0.0 }
 0x12c   :  { %v771_v58 = vpack.c.bf16 %v770_v57, %v770_v57 }
 0x12e   :  { %1019 = vmatmul.mubr.msk.bf16.vlgmr.msra.gmra.mrb[8].mxu0 %vm795_vm2, %v771_v58 }
 0x201   :  { %v833_v60 = vpop.f32.mrb[8].mxu0 }
 0x202   :  { %v834_v61 = vadd.f32 %v919_v59, %v833_v60  ;;  %v1020_v62 = vpop.f32.mrb[9].mxu0 }
 0x203   :  { %v836_v63 = vpop.f32.mrb[10].mxu0 }
 0x204   :  { %839 = vst [vmem:[#allocation3] sm:$0x3] %v834_v61  ;;  %v1021_v0 = vpop.f32.mrb[11].mxu0 }
 0x205   :  { %1105 = shalt.err (!%p1102_p4)
}
 0x206   :  { %s1106_s4 = scalar_lea.hbm %s1387_s5, 32 }
 0x207   :  { %p1107_p5 = scmp.ne.s32.totalorder %s1387_s5, %s1106_s4  ;;  %p1110_p6 = scmp.lt.u32.totalorder %s1106_s4, %s1387_s5 }
 0x209   :  { %p1112_p7 = pnand %p1110_p6, %p1107_p5 }
 0x20b   :  { %1115 = shalt.err (!%p1112_p7)
}
 0x20c   :  { %849 = dma.vmem_to_hbm [thread:$0]  %s847_s6, 32, %s1387_s5, [#allocation4]  }
 0x20d   :  { %1116 = dma.done.wait [#allocation4], 32  }
 0x20e   :  { %1117 = vsyncadd [#allocation4], 4294967264 }
 0x20f   :  { %853 = vsyncpa [#allocation4], 1 }

</bundles_post_ra>
